<compile_context>
chip_gen: v7x
topology: tpu7x:2x2x1
jax: 0.10.0
libtpu: 0.0.40
codegen_flags: <defaults>
</compile_context>

<pallas_src>
import jax
import jax.numpy as jnp
from jax.experimental import pallas as pl
from jax.experimental.pallas import tpu as pltpu

EPS = 1e-5  # torch.nn.LayerNorm default


def _round_up(x, m):
    return ((x + m - 1) // m) * m


def late_fusion_kernel(x_ref, w0_ref, wl_ref, p_ref, wh_ref, bh_ref, out_ref):
    """One batch tile: (tb, T+I) -> lane-dense bf16 logits (tb, OP).

    p_ref row layout (stacked small f32 params, one DMA):
      row 0                     : b0
      rows 1 .. n               : bl          (n = n_layers)
      rows n+1 .. 2n+1          : gamma       (n_layers+1 rows)
      rows 2n+2 .. 3n+2         : beta        (n_layers+1 rows)
    """
    bf16 = jnp.bfloat16
    n_layers = wl_ref.shape[0]
    g_off = 1 + n_layers
    bt_off = 2 + 2 * n_layers

    def ln_silu(h, j):
        # 2-D (1, F) slices: broadcast directly, no 1-D -> 2-D relayout.
        gamma = p_ref[g_off + j:g_off + j + 1, :]
        beta = p_ref[bt_off + j:bt_off + j + 1, :]
        # One-pass statistics; clamp variance (f32 cancellation can go slightly <0).
        mu = jnp.mean(h, axis=-1, keepdims=True)
        m2 = jnp.mean(h * h, axis=-1, keepdims=True)
        var = jnp.maximum(m2 - mu * mu, 0.0)
        s = jax.lax.rsqrt(var + EPS)        # (tb, 1) per-row scalar
        t = mu * s                          # (tb, 1) per-row scalar
        h = (h * s - t) * gamma + beta      # two FMA-able full-width steps
        return h * jax.nn.sigmoid(h)        # SiLU (sigmoid -> EUP slot)

    # Layer 0: concat already done in wrapper -> single K = T+I matmul.
    h = jnp.dot(x_ref[...].astype(bf16), w0_ref[...],
                preferred_element_type=jnp.float32) + p_ref[0:1, :]
    h = ln_silu(h, 0)
    # TODO(synk): dropout is the eval-mode identity; not usable for training as-is.

    # Hidden layers: F -> F (static unroll over small n_layers).
    for l in range(n_layers):
        h = jnp.dot(h.astype(bf16), wl_ref[l],
                    preferred_element_type=jnp.float32) + p_ref[1 + l:2 + l, :]
        h = ln_silu(h, l + 1)

    # Head: F -> OP (lane-dense; zero-padded columns sliced off in wrapper).
    logits = jnp.dot(h.astype(bf16), wh_ref[...],
                     preferred_element_type=jnp.float32) + bh_ref[...]
    out_ref[...] = logits.astype(out_ref.dtype)


def late_fusion_head(text_embedding, image_embedding, params, labels=None):
    """JAX wrapper mirroring LateFusionHead.forward (inference semantics)."""
    B, T = text_embedding.shape
    I = image_embedding.shape[1]
    Din = T + I
    F = params["w0"].shape[1]
    O = params["wh"].shape[1]
    n_layers = params["wl"].shape[0]

    # --- parameter prep (trace-time; folded by XLA) -------------------------
    w0 = params["w0"].astype(jnp.bfloat16)                       # (Din, F)
    wl = params["wl"].astype(jnp.bfloat16)                       # (n, F, F)
    OP = _round_up(O, 128)                                       # lane-dense head
    wh = jnp.zeros((F, OP), jnp.float32).at[:, :O].set(params["wh"]).astype(jnp.bfloat16)
    bh = jnp.zeros((1, OP), jnp.float32).at[:, :O].set(params["bh"])
    # Stack the tiny f32 per-layer params into one operand (one DMA, one BlockSpec).
    pstack = jnp.concatenate(
        [params["b0"], params["bl"], params["gamma"], params["beta"]], axis=0)
    P_rows = pstack.shape[0]                                     # 3*n_layers + 3

    # Concat fused into the wrapper: with tiny T, I a single K=T+I matmul beats two.
    x = jnp.concatenate([text_embedding, image_embedding], axis=-1)

    # --- batch tiling --------------------------------------------------------
    # Multiple of 16 (bf16 output sublane packing); >=2 grid steps when B allows
    # so the "parallel" batch axis shards across v7x's 2 TensorCores.
    tb = min(256, _round_up(pl.cdiv(B, 2), 16))
    Bp = _round_up(B, tb)
    if Bp != B:
        x = jnp.pad(x, ((0, Bp - B), (0, 0)))
    grid = (Bp // tb,)

    # --- VMEM budget (resident params single-buffered + pipelined act tiles) --
    resident_param_bytes = (
        2 * (Din * F + n_layers * F * F + F * OP)                 # bf16 weights, 1 buffer
        + 4 * (_round_up(P_rows, 8) * F + OP)                     # f32 pstack + bh
    )
    act_bytes = 2 * (tb * Din * 4) + 2 * (tb * OP * 2)            # 2x in tile + 2x bf16 out
    scratch_bytes = 6 * tb * F * 4                                # h / bf16 copies / LN temps
    vmem_limit = min(120 << 20,
                     max(int(1.5 * (resident_param_bytes + act_bytes + scratch_bytes)),
                         32 << 20))

    # Advisory cost estimate so XLA overlaps surrounding glue with the kernel.
    flops = 2 * Bp * (Din * F + n_layers * F * F + F * OP)
    transcendentals = Bp * F * (n_layers + 1)                     # sigmoid per SiLU element
    bytes_accessed = (
        2 * (Din * F + n_layers * F * F + F * OP)                 # bf16 weights
        + 4 * (P_rows * F + OP)                                   # f32 small params
        + 4 * Bp * Din + 2 * Bp * OP                              # f32 in, bf16 out
    )

    const2 = lambda i: (0, 0)
    resident = pl.Buffered(1)   # constant-index params: no overlap benefit from 2 buffers
    logits_full = pl.pallas_call(
        late_fusion_kernel,
        out_shape=jax.ShapeDtypeStruct((Bp, OP), jnp.bfloat16),
        grid=grid,
        in_specs=[
            pl.BlockSpec((tb, Din), lambda i: (i, 0)),                      # x tile (pipelined)
            pl.BlockSpec((Din, F), const2, pipeline_mode=resident),         # w0      (resident)
            pl.BlockSpec((n_layers, F, F), lambda i: (0, 0, 0),
                         pipeline_mode=resident),                           # wl stack (resident)
            pl.BlockSpec((P_rows, F), const2, pipeline_mode=resident),      # b0/bl/gamma/beta
            pl.BlockSpec((F, OP), const2, pipeline_mode=resident),          # wh (lane-padded)
            pl.BlockSpec((1, OP), const2, pipeline_mode=resident),          # bh (lane-padded)
        ],
        out_specs=pl.BlockSpec((tb, OP), lambda i: (i, 0)),
        compiler_params=pltpu.CompilerParams(
            dimension_semantics=("parallel",),                              # 2 TCs on v7x
            vmem_limit_bytes=vmem_limit),
        cost_estimate=pl.CostEstimate(
            flops=flops, transcendentals=transcendentals,
            bytes_accessed=bytes_accessed),
    )(x, w0, wl, pstack, wh, bh)

    # Strip batch padding / zero-padded lanes, restore f32 before anything numerical.
    logits = logits_full[:B, :O].astype(jnp.float32)

    loss = None
    if labels is not None:
        # nn.CrossEntropyLoss (mean reduction) on the small (B, O) logits.
        logp = jax.nn.log_softmax(logits, axis=-1)
        loss = -jnp.mean(jnp.take_along_axis(logp, labels[:, None], axis=-1))
    return {"loss": loss, "logits": logits}


def init_params(key, input_dims, ffn_dim, n_layers, output_dims):
    """Deterministic synthetic init (shapes match the PyTorch module; (in, out) layout)."""
    ks = jax.random.split(key, 6)
    scale = 0.02
    return {
        # nn.Linear(input_dims, ffn_dim), stored as (in, out)
        "w0": scale * jax.random.normal(ks[0], (input_dims, ffn_dim), jnp.float32),
        "b0": scale * jax.random.normal(ks[1], (1, ffn_dim), jnp.float32),
        # n_layers x nn.Linear(ffn_dim, ffn_dim)
        "wl": scale * jax.random.normal(ks[2], (n_layers, ffn_dim, ffn_dim), jnp.float32),
        "bl": scale * jax.random.normal(ks[3], (n_layers, ffn_dim), jnp.float32),
        # (n_layers + 1) x nn.LayerNorm(ffn_dim)
        "gamma": jnp.ones((n_layers + 1, ffn_dim), jnp.float32),
        "beta": jnp.zeros((n_layers + 1, ffn_dim), jnp.float32),
        # nn.Linear(ffn_dim, output_dims)
        "wh": scale * jax.random.normal(ks[4], (ffn_dim, output_dims), jnp.float32),
        "bh": scale * jax.random.normal(ks[5], (1, output_dims), jnp.float32),
    }


if __name__ == "__main__":
    # model_params = {'ffn_dim': 128, 'n_layers': 2, 'dropout': 0.1}
    B = 8
    TEXT_DIM = 16
    IMAGE_DIM = 16
    INPUT_DIMS = TEXT_DIM + IMAGE_DIM  # concat along last axis
    FFN_DIM = 128
    N_LAYERS = 2
    OUTPUT_DIMS = 8

    key = jax.random.PRNGKey(0)
    k_txt, k_img, k_par = jax.random.split(key, 3)
    text_embedding = jax.random.normal(k_txt, (B, TEXT_DIM), jnp.float32)
    image_embedding = jax.random.normal(k_img, (B, IMAGE_DIM), jnp.float32)
    labels = jnp.arange(B, dtype=jnp.int32) % OUTPUT_DIMS

    params = init_params(k_par, INPUT_DIMS, FFN_DIM, N_LAYERS, OUTPUT_DIMS)

    out = late_fusion_head(text_embedding, image_embedding, params, labels=labels)
    jax.block_until_ready(out["logits"])
    jax.block_until_ready(out["loss"])

    assert out["logits"].shape == (B, OUTPUT_DIMS)
    assert out["loss"].shape == ()
    assert bool(jnp.isfinite(out["loss"]))
    assert bool(jnp.all(jnp.isfinite(out["logits"])))
    print("KERNEL_OK")
</pallas_src>

<mosaic_0001>
module attributes {stable_mosaic.version = 11 : i64} {
  func.func @late_fusion_kernel(%arg0: i32, %arg1: memref<16x32xf32, #tpu.memory_space<vmem>>, %arg2: memref<32x128xbf16, #tpu.memory_space<vmem>>, %arg3: memref<2x128x128xbf16, #tpu.memory_space<vmem>>, %arg4: memref<9x128xf32, #tpu.memory_space<vmem>>, %arg5: memref<128x128xbf16, #tpu.memory_space<vmem>>, %arg6: memref<1x128xf32, #tpu.memory_space<vmem>>, %arg7: memref<16x128xbf16, #tpu.memory_space<vmem>>) attributes {dimension_semantics = [#tpu.dimension_semantics<parallel>], iteration_bounds = array<i64: 1>, scalar_prefetch = 0 : i64, scratch_operands = 0 : i64, tpu.core_type = #tpu.core_type<tc>, window_params = [{transform_indices = @transform_0, window_bounds = array<i64: 16, 32>}, {pipeline_mode = #tpu.pipeline_mode<synchronous>, transform_indices = @transform_1, window_bounds = array<i64: 32, 128>}, {pipeline_mode = #tpu.pipeline_mode<synchronous>, transform_indices = @transform_2, window_bounds = array<i64: 2, 128, 128>}, {pipeline_mode = #tpu.pipeline_mode<synchronous>, transform_indices = @transform_3, window_bounds = array<i64: 9, 128>}, {pipeline_mode = #tpu.pipeline_mode<synchronous>, transform_indices = @transform_4, window_bounds = array<i64: 128, 128>}, {pipeline_mode = #tpu.pipeline_mode<synchronous>, transform_indices = @transform_5, window_bounds = array<i64: 1, 128>}, {transform_indices = @transform_6, window_bounds = array<i64: 16, 128>}]} {
    %c0 = arith.constant 0 : index
    %c0_0 = arith.constant 0 : index
    %0 = vector.load %arg1[%c0, %c0_0] : memref<16x32xf32, #tpu.memory_space<vmem>>, vector<16x32xf32>
    %1 = arith.truncf %0 : vector<16x32xf32> to vector<16x32xbf16>
    %c0_1 = arith.constant 0 : index
    %c0_2 = arith.constant 0 : index
    %2 = vector.load %arg2[%c0_1, %c0_2] : memref<32x128xbf16, #tpu.memory_space<vmem>>, vector<32x128xbf16>
    %cst = arith.constant dense<0.000000e+00> : vector<16x128xf32>
    %3 = tpu.matmul %1, %2, %cst {dimension_numbers = #tpu.dot_dimension_numbers<[1], [0], [0], [1], [0, 0, 1, 1], [], []>} : vector<16x32xbf16>, vector<32x128xbf16>, vector<16x128xf32> -> vector<16x128xf32>
    %c0_3 = arith.constant 0 : index
    %c0_4 = arith.constant 0 : index
    %4 = vector.load %arg4[%c0_3, %c0_4] : memref<9x128xf32, #tpu.memory_space<vmem>>, vector<1x128xf32>
    %5 = vector.broadcast %4 : vector<1x128xf32> to vector<16x128xf32>
    %6 = arith.addf %3, %5 : vector<16x128xf32>
    %c3 = arith.constant 3 : index
    %c0_5 = arith.constant 0 : index
    %7 = vector.load %arg4[%c3, %c0_5] : memref<9x128xf32, #tpu.memory_space<vmem>>, vector<1x128xf32>
    %c6 = arith.constant 6 : index
    %c0_6 = arith.constant 0 : index
    %8 = vector.load %arg4[%c6, %c0_6] : memref<9x128xf32, #tpu.memory_space<vmem>>, vector<1x128xf32>
    %cst_7 = arith.constant dense<0.000000e+00> : vector<16xf32>
    %9 = vector.multi_reduction <add>, %6, %cst_7 [1] : vector<16x128xf32> to vector<16xf32>
    %10 = vector.shape_cast %9 : vector<16xf32> to vector<16x1xf32>
    %cst_8 = arith.constant 1.280000e+02 : f32
    %11 = vector.broadcast %cst_8 : f32 to vector<16x1xf32>
    %12 = arith.divf %10, %11 : vector<16x1xf32>
    %13 = arith.mulf %6, %6 : vector<16x128xf32>
    %cst_9 = arith.constant dense<0.000000e+00> : vector<16xf32>
    %14 = vector.multi_reduction <add>, %13, %cst_9 [1] : vector<16x128xf32> to vector<16xf32>
    %15 = vector.shape_cast %14 : vector<16xf32> to vector<16x1xf32>
    %cst_10 = arith.constant 1.280000e+02 : f32
    %16 = vector.broadcast %cst_10 : f32 to vector<16x1xf32>
    %17 = arith.divf %15, %16 : vector<16x1xf32>
    %18 = arith.mulf %12, %12 : vector<16x1xf32>
    %19 = arith.subf %17, %18 : vector<16x1xf32>
    %cst_11 = arith.constant 0.000000e+00 : f32
    %20 = vector.broadcast %cst_11 : f32 to vector<16x1xf32>
    %21 = arith.maximumf %19, %20 : vector<16x1xf32>
    %cst_12 = arith.constant 9.99999974E-6 : f32
    %22 = vector.broadcast %cst_12 : f32 to vector<16x1xf32>
    %23 = arith.addf %21, %22 : vector<16x1xf32>
    %24 = math.rsqrt %23 : vector<16x1xf32>
    %25 = arith.mulf %12, %24 : vector<16x1xf32>
    %26 = vector.broadcast %24 : vector<16x1xf32> to vector<16x128xf32>
    %27 = arith.mulf %6, %26 : vector<16x128xf32>
    %28 = vector.broadcast %25 : vector<16x1xf32> to vector<16x128xf32>
    %29 = arith.subf %27, %28 : vector<16x128xf32>
    %30 = vector.broadcast %7 : vector<1x128xf32> to vector<16x128xf32>
    %31 = arith.mulf %29, %30 : vector<16x128xf32>
    %32 = vector.broadcast %8 : vector<1x128xf32> to vector<16x128xf32>
    %33 = arith.addf %31, %32 : vector<16x128xf32>
    %34 = arith.negf %33 : vector<16x128xf32>
    %35 = math.exp %34 : vector<16x128xf32>
    %cst_13 = arith.constant 1.000000e+00 : f32
    %36 = vector.broadcast %cst_13 : f32 to vector<16x128xf32>
    %37 = arith.addf %36, %35 : vector<16x128xf32>
    %38 = arith.divf %36, %37 : vector<16x128xf32>
    %39 = arith.mulf %33, %38 : vector<16x128xf32>
    %40 = arith.truncf %39 : vector<16x128xf32> to vector<16x128xbf16>
    %c0_14 = arith.constant 0 : index
    %c0_15 = arith.constant 0 : index
    %c0_16 = arith.constant 0 : index
    %41 = vector.load %arg3[%c0_14, %c0_15, %c0_16] : memref<2x128x128xbf16, #tpu.memory_space<vmem>>, vector<1x128x128xbf16>
    %42 = vector.shape_cast %41 : vector<1x128x128xbf16> to vector<128x128xbf16>
    %cst_17 = arith.constant dense<0.000000e+00> : vector<16x128xf32>
    %43 = tpu.matmul %40, %42, %cst_17 {dimension_numbers = #tpu.dot_dimension_numbers<[1], [0], [0], [1], [0, 0, 1, 1], [], []>} : vector<16x128xbf16>, vector<128x128xbf16>, vector<16x128xf32> -> vector<16x128xf32>
    %c1 = arith.constant 1 : index
    %c0_18 = arith.constant 0 : index
    %44 = vector.load %arg4[%c1, %c0_18] : memref<9x128xf32, #tpu.memory_space<vmem>>, vector<1x128xf32>
    %45 = vector.broadcast %44 : vector<1x128xf32> to vector<16x128xf32>
    %46 = arith.addf %43, %45 : vector<16x128xf32>
    %c4 = arith.constant 4 : index
    %c0_19 = arith.constant 0 : index
    %47 = vector.load %arg4[%c4, %c0_19] : memref<9x128xf32, #tpu.memory_space<vmem>>, vector<1x128xf32>
    %c7 = arith.constant 7 : index
    %c0_20 = arith.constant 0 : index
    %48 = vector.load %arg4[%c7, %c0_20] : memref<9x128xf32, #tpu.memory_space<vmem>>, vector<1x128xf32>
    %cst_21 = arith.constant dense<0.000000e+00> : vector<16xf32>
    %49 = vector.multi_reduction <add>, %46, %cst_21 [1] : vector<16x128xf32> to vector<16xf32>
    %50 = vector.shape_cast %49 : vector<16xf32> to vector<16x1xf32>
    %cst_22 = arith.constant 1.280000e+02 : f32
    %51 = vector.broadcast %cst_22 : f32 to vector<16x1xf32>
    %52 = arith.divf %50, %51 : vector<16x1xf32>
    %53 = arith.mulf %46, %46 : vector<16x128xf32>
    %cst_23 = arith.constant dense<0.000000e+00> : vector<16xf32>
    %54 = vector.multi_reduction <add>, %53, %cst_23 [1] : vector<16x128xf32> to vector<16xf32>
    %55 = vector.shape_cast %54 : vector<16xf32> to vector<16x1xf32>
    %cst_24 = arith.constant 1.280000e+02 : f32
    %56 = vector.broadcast %cst_24 : f32 to vector<16x1xf32>
    %57 = arith.divf %55, %56 : vector<16x1xf32>
    %58 = arith.mulf %52, %52 : vector<16x1xf32>
    %59 = arith.subf %57, %58 : vector<16x1xf32>
    %cst_25 = arith.constant 0.000000e+00 : f32
    %60 = vector.broadcast %cst_25 : f32 to vector<16x1xf32>
    %61 = arith.maximumf %59, %60 : vector<16x1xf32>
    %cst_26 = arith.constant 9.99999974E-6 : f32
    %62 = vector.broadcast %cst_26 : f32 to vector<16x1xf32>
    %63 = arith.addf %61, %62 : vector<16x1xf32>
    %64 = math.rsqrt %63 : vector<16x1xf32>
    %65 = arith.mulf %52, %64 : vector<16x1xf32>
    %66 = vector.broadcast %64 : vector<16x1xf32> to vector<16x128xf32>
    %67 = arith.mulf %46, %66 : vector<16x128xf32>
    %68 = vector.broadcast %65 : vector<16x1xf32> to vector<16x128xf32>
    %69 = arith.subf %67, %68 : vector<16x128xf32>
    %70 = vector.broadcast %47 : vector<1x128xf32> to vector<16x128xf32>
    %71 = arith.mulf %69, %70 : vector<16x128xf32>
    %72 = vector.broadcast %48 : vector<1x128xf32> to vector<16x128xf32>
    %73 = arith.addf %71, %72 : vector<16x128xf32>
    %74 = arith.negf %73 : vector<16x128xf32>
    %75 = math.exp %74 : vector<16x128xf32>
    %cst_27 = arith.constant 1.000000e+00 : f32
    %76 = vector.broadcast %cst_27 : f32 to vector<16x128xf32>
    %77 = arith.addf %76, %75 : vector<16x128xf32>
    %78 = arith.divf %76, %77 : vector<16x128xf32>
    %79 = arith.mulf %73, %78 : vector<16x128xf32>
    %80 = arith.truncf %79 : vector<16x128xf32> to vector<16x128xbf16>
    %c1_28 = arith.constant 1 : index
    %c0_29 = arith.constant 0 : index
    %c0_30 = arith.constant 0 : index
    %81 = vector.load %arg3[%c1_28, %c0_29, %c0_30] : memref<2x128x128xbf16, #tpu.memory_space<vmem>>, vector<1x128x128xbf16>
    %82 = vector.shape_cast %81 : vector<1x128x128xbf16> to vector<128x128xbf16>
    %cst_31 = arith.constant dense<0.000000e+00> : vector<16x128xf32>
    %83 = tpu.matmul %80, %82, %cst_31 {dimension_numbers = #tpu.dot_dimension_numbers<[1], [0], [0], [1], [0, 0, 1, 1], [], []>} : vector<16x128xbf16>, vector<128x128xbf16>, vector<16x128xf32> -> vector<16x128xf32>
    %c2 = arith.constant 2 : index
    %c0_32 = arith.constant 0 : index
    %84 = vector.load %arg4[%c2, %c0_32] : memref<9x128xf32, #tpu.memory_space<vmem>>, vector<1x128xf32>
    %85 = vector.broadcast %84 : vector<1x128xf32> to vector<16x128xf32>
    %86 = arith.addf %83, %85 : vector<16x128xf32>
    %c5 = arith.constant 5 : index
    %c0_33 = arith.constant 0 : index
    %87 = vector.load %arg4[%c5, %c0_33] : memref<9x128xf32, #tpu.memory_space<vmem>>, vector<1x128xf32>
    %c8 = arith.constant 8 : index
    %c0_34 = arith.constant 0 : index
    %88 = vector.load %arg4[%c8, %c0_34] : memref<9x128xf32, #tpu.memory_space<vmem>>, vector<1x128xf32>
    %cst_35 = arith.constant dense<0.000000e+00> : vector<16xf32>
    %89 = vector.multi_reduction <add>, %86, %cst_35 [1] : vector<16x128xf32> to vector<16xf32>
    %90 = vector.shape_cast %89 : vector<16xf32> to vector<16x1xf32>
    %cst_36 = arith.constant 1.280000e+02 : f32
    %91 = vector.broadcast %cst_36 : f32 to vector<16x1xf32>
    %92 = arith.divf %90, %91 : vector<16x1xf32>
    %93 = arith.mulf %86, %86 : vector<16x128xf32>
    %cst_37 = arith.constant dense<0.000000e+00> : vector<16xf32>
    %94 = vector.multi_reduction <add>, %93, %cst_37 [1] : vector<16x128xf32> to vector<16xf32>
    %95 = vector.shape_cast %94 : vector<16xf32> to vector<16x1xf32>
    %cst_38 = arith.constant 1.280000e+02 : f32
    %96 = vector.broadcast %cst_38 : f32 to vector<16x1xf32>
    %97 = arith.divf %95, %96 : vector<16x1xf32>
    %98 = arith.mulf %92, %92 : vector<16x1xf32>
    %99 = arith.subf %97, %98 : vector<16x1xf32>
    %cst_39 = arith.constant 0.000000e+00 : f32
    %100 = vector.broadcast %cst_39 : f32 to vector<16x1xf32>
    %101 = arith.maximumf %99, %100 : vector<16x1xf32>
    %cst_40 = arith.constant 9.99999974E-6 : f32
    %102 = vector.broadcast %cst_40 : f32 to vector<16x1xf32>
    %103 = arith.addf %101, %102 : vector<16x1xf32>
    %104 = math.rsqrt %103 : vector<16x1xf32>
    %105 = arith.mulf %92, %104 : vector<16x1xf32>
    %106 = vector.broadcast %104 : vector<16x1xf32> to vector<16x128xf32>
    %107 = arith.mulf %86, %106 : vector<16x128xf32>
    %108 = vector.broadcast %105 : vector<16x1xf32> to vector<16x128xf32>
    %109 = arith.subf %107, %108 : vector<16x128xf32>
    %110 = vector.broadcast %87 : vector<1x128xf32> to vector<16x128xf32>
    %111 = arith.mulf %109, %110 : vector<16x128xf32>
    %112 = vector.broadcast %88 : vector<1x128xf32> to vector<16x128xf32>
    %113 = arith.addf %111, %112 : vector<16x128xf32>
    %114 = arith.negf %113 : vector<16x128xf32>
    %115 = math.exp %114 : vector<16x128xf32>
    %cst_41 = arith.constant 1.000000e+00 : f32
    %116 = vector.broadcast %cst_41 : f32 to vector<16x128xf32>
    %117 = arith.addf %116, %115 : vector<16x128xf32>
    %118 = arith.divf %116, %117 : vector<16x128xf32>
    %119 = arith.mulf %113, %118 : vector<16x128xf32>
    %120 = arith.truncf %119 : vector<16x128xf32> to vector<16x128xbf16>
    %c0_42 = arith.constant 0 : index
    %c0_43 = arith.constant 0 : index
    %121 = vector.load %arg5[%c0_42, %c0_43] : memref<128x128xbf16, #tpu.memory_space<vmem>>, vector<128x128xbf16>
    %cst_44 = arith.constant dense<0.000000e+00> : vector<16x128xf32>
    %122 = tpu.matmul %120, %121, %cst_44 {dimension_numbers = #tpu.dot_dimension_numbers<[1], [0], [0], [1], [0, 0, 1, 1], [], []>} : vector<16x128xbf16>, vector<128x128xbf16>, vector<16x128xf32> -> vector<16x128xf32>
    %c0_45 = arith.constant 0 : index
    %c0_46 = arith.constant 0 : index
    %123 = vector.load %arg6[%c0_45, %c0_46] : memref<1x128xf32, #tpu.memory_space<vmem>>, vector<1x128xf32>
    %124 = vector.broadcast %123 : vector<1x128xf32> to vector<16x128xf32>
    %125 = arith.addf %122, %124 : vector<16x128xf32>
    %126 = arith.truncf %125 : vector<16x128xf32> to vector<16x128xbf16>
    %c0_47 = arith.constant 0 : index
    %c0_48 = arith.constant 0 : index
    %127 = vector.load %arg7[%c0_47, %c0_48] : memref<16x128xbf16, #tpu.memory_space<vmem>>, vector<16x128xbf16>
    tpu.vector_store %arg7[%c0_47, %c0_48], %126 {strides = array<i32>} : memref<16x128xbf16, #tpu.memory_space<vmem>>, vector<16x128xbf16>,
    return
  }
  func.func @transform_0(%arg0: i32) -> (i32, i32) {
    %c0_i32 = arith.constant 0 : i32
    %c0_i32_0 = arith.constant 0 : i32
    return %arg0, %c0_i32 : i32, i32
  }
  func.func @transform_1(%arg0: i32) -> (i32, i32) {
    %c0_i32 = arith.constant 0 : i32
    %c0_i32_0 = arith.constant 0 : i32
    %c0_i32_1 = arith.constant 0 : i32
    return %c0_i32, %c0_i32_0 : i32, i32
  }
  func.func @transform_2(%arg0: i32) -> (i32, i32, i32) {
    %c0_i32 = arith.constant 0 : i32
    %c0_i32_0 = arith.constant 0 : i32
    %c0_i32_1 = arith.constant 0 : i32
    %c0_i32_2 = arith.constant 0 : i32
    return %c0_i32, %c0_i32_0, %c0_i32_1 : i32, i32, i32
  }
  func.func @transform_3(%arg0: i32) -> (i32, i32) {
    %c0_i32 = arith.constant 0 : i32
    %c0_i32_0 = arith.constant 0 : i32
    %c0_i32_1 = arith.constant 0 : i32
    return %c0_i32, %c0_i32_0 : i32, i32
  }
  func.func @transform_4(%arg0: i32) -> (i32, i32) {
    %c0_i32 = arith.constant 0 : i32
    %c0_i32_0 = arith.constant 0 : i32
    %c0_i32_1 = arith.constant 0 : i32
    return %c0_i32, %c0_i32_0 : i32, i32
  }
  func.func @transform_5(%arg0: i32) -> (i32, i32) {
    %c0_i32 = arith.constant 0 : i32
    %c0_i32_0 = arith.constant 0 : i32
    %c0_i32_1 = arith.constant 0 : i32
    return %c0_i32, %c0_i32_0 : i32, i32
  }
  func.func @transform_6(%arg0: i32) -> (i32, i32) {
    %c0_i32 = arith.constant 0 : i32
    %c0_i32_0 = arith.constant 0 : i32
    return %arg0, %c0_i32 : i32, i32
  }
}

</mosaic_0001>

<bundles_post_ra>
// kernel: tpu_custom_call.1
= control target key start
LH: loop header
LB: loop body
LE: loop exit
PB: predicated region body
PF: predicated region fallthrough
CT: control target
= control target key end

     0   :  { %11 = vsyncpa [#allocation3], 0  ;;  %s1234_s0 = inlined_call_operand.hbm [shape: f32[16,32], index: 0, kind: input, shape index: {}]   ;;  %s1235_s1 = inlined_call_operand.hbm [shape: bf16[32,128], index: 1, kind: input, shape index: {}]   ;;  %s1236_s2 = inlined_call_operand.hbm [shape: bf16[2,128,128], index: 2, kind: input, shape index: {}]   ;;  %s1237_s3 = inlined_call_operand.hbm [shape: f32[9,128], index: 3, kind: input, shape index: {}]   ;;  %s1238_s4 = inlined_call_operand.hbm [shape: bf16[128,128], index: 4, kind: input, shape index: {}]   ;;  %s1239_s5 = inlined_call_operand.vmem [shape: f32[1,128], index: 5, kind: input, shape index: {}]   ;;  %s1240_s6 = inlined_call_operand.hbm [shape: bf16[16,128], index: 6, kind: output, shape index: {}]  }
   0x1   :  { %12 = vsyncpa [#allocation6], 0 }
   0x2   :  { %13 = vsyncpa [#allocation9], 0 }
   0x3   :  { %14 = vsyncpa [#allocation4], 0  ;;  %s1066_s21 = smov [#allocation5]   ;;  %s926_s25 = scalar_lea.hbm %s1235_s1, 256 }
   0x4   :  { %s32_s22 = sshll.u32 %s1066_s21, 4  ;;  %p927_p0 = scmp.ne.s32.totalorder %s1235_s1, %s926_s25  ;;  %s33_s22 = int_to_ptr.vmem [resolvable:$true] %s32_s22 }
   0x5   :  { %p930_p1 = scmp.lt.u32.totalorder %s926_s25, %s1235_s1 }
   0x7   :  { %p932_p2 = pnand %p930_p1, %p927_p0 }
   0x9   :  { %935 = shalt.err (!%p932_p2)
}
   0xa   :  { %s936_s30 = scalar_lea.vmem %s33_s22, 256  ;;  %p941_p4 = scmp.lt.s32.totalorder %s33_s22, %s33_s22 }
   0xb   :  { %p937_p3 = scmp.ne.s32.totalorder %s33_s22, %s936_s30  ;;  %p942_p5 = scmp.lt.s32.totalorder %s936_s30, %s936_s30 }
   0xd   :  { %p943_p6 = por %p942_p5, %p941_p4 }
   0xf   :  { %p944_p7 = pnand %p943_p6, %p937_p3 }
  0x11   :  { %947 = shalt.err (!%p944_p7)
}
  0x12   :  { %s1067_s7 = smov 64   ;;  %s1068_s8 = smov 4  }
  0x13   :  { %38 = dma.hbm_to_vmem [thread:$0]  %s1235_s1, 256, %s33_s22, [#allocation6], %s1067_s7, %s1067_s7, %s1068_s8  }
  0x14   :  { %s1069_s11 = smov [#allocation8]   ;;  %s1070_s13 = smov [#allocation2]  }
  0x15   :  { %s56_s12 = sshll.u32 %s1069_s11, 4  ;;  %s20_s14 = sshll.u32 %s1070_s13, 4  ;;  %s57_s12 = int_to_ptr.vmem [resolvable:$true] %s56_s12  ;;  %s21_s14 = int_to_ptr.vmem [resolvable:$true] %s20_s14 }
  0x16   :  { %s948_s17 = scalar_lea.hbm %s1237_s3, 256 }
  0x17   :  { %p949_p8 = scmp.ne.s32.totalorder %s1237_s3, %s948_s17  ;;  %p952_p9 = scmp.lt.u32.totalorder %s948_s17, %s1237_s3 }
  0x19   :  { %p954_p10 = pnand %p952_p9, %p949_p8 }
  0x1b   :  { %957 = shalt.err (!%p954_p10)
}
  0x1c   :  { %s958_s1 = scalar_lea.vmem %s57_s12, 256  ;;  %p963_p12 = scmp.lt.s32.totalorder %s57_s12, %s57_s12 }
  0x1d   :  { %p959_p11 = scmp.ne.s32.totalorder %s57_s12, %s958_s1  ;;  %p964_p13 = scmp.lt.s32.totalorder %s958_s1, %s958_s1 }
  0x1f   :  { %p965_p0 = por %p964_p13, %p963_p12 }
  0x21   :  { %p966_p1 = pnand %p965_p0, %p959_p11 }
  0x23   :  { %969 = shalt.err (!%p966_p1)
}
  0x24   :  { %s1071_s22 = smov 128   ;;  %s1072_s23 = smov 8  }
  0x25   :  { %62 = dma.hbm_to_vmem [thread:$0]  %s1237_s3, 256, %s57_s12, [#allocation9], %s1071_s22, %s1071_s22, %s1072_s23  }
  0x26   :  { %s970_s28 = scalar_lea.hbm %s1234_s0, 256 }
  0x27   :  { %p971_p2 = scmp.ne.s32.totalorder %s1234_s0, %s970_s28  ;;  %p974_p3 = scmp.lt.u32.totalorder %s970_s28, %s1234_s0 }
  0x29   :  { %p976_p4 = pnand %p974_p3, %p971_p2 }
  0x2b   :  { %979 = shalt.err (!%p976_p4)
}
  0x2c   :  { %s980_s11 = scalar_lea.vmem %s21_s14, 256  ;;  %p985_p6 = scmp.lt.s32.totalorder %s21_s14, %s21_s14 }
  0x2d   :  { %p981_p5 = scmp.ne.s32.totalorder %s21_s14, %s980_s11  ;;  %p986_p7 = scmp.lt.s32.totalorder %s980_s11, %s980_s11 }
  0x2f   :  { %p987_p8 = por %p986_p7, %p985_p6 }
  0x31   :  { %p988_p9 = pnand %p987_p8, %p981_p5 }
  0x33   :  { %991 = shalt.err (!%p988_p9)
}
  0x34   :  { %26 = dma.hbm_to_vmem [thread:$0]  %s1234_s0, 256, %s21_s14, [#allocation3], %s1071_s22, %s1071_s22, %s1072_s23  }
  0x35   :  { %s1073_s13 = smov [#allocation7]   ;;  %s1074_s16 = smov [#allocation10]  }
  0x36   :  { %s44_s15 = sshll.u32 %s1073_s13, 4  ;;  %s68_s17 = sshll.u32 %s1074_s16, 4  ;;  %s45_s15 = int_to_ptr.vmem [resolvable:$true] %s44_s15  ;;  %s69_s17 = int_to_ptr.vmem [resolvable:$true] %s68_s17 }
  0x37   :  { %s992_s20 = scalar_lea.hbm %s1236_s2, 2048 }
  0x38   :  { %p993_p10 = scmp.ne.s32.totalorder %s1236_s2, %s992_s20  ;;  %p996_p11 = scmp.lt.u32.totalorder %s992_s20, %s1236_s2 }
  0x3a   :  { %p998_p12 = pnand %p996_p11, %p993_p10 }
  0x3c   :  { %1001 = shalt.err (!%p998_p12)
}
  0x3d   :  { %s1002_s0 = scalar_lea.vmem %s45_s15, 2048  ;;  %p1007_p0 = scmp.lt.s32.totalorder %s45_s15, %s45_s15 }
  0x3e   :  { %p1003_p13 = scmp.ne.s32.totalorder %s45_s15, %s1002_s0  ;;  %p1008_p1 = scmp.lt.s32.totalorder %s1002_s0, %s1002_s0 }
  0x40   :  { %p1009_p2 = por %p1008_p1, %p1007_p0 }
  0x42   :  { %p1010_p3 = pnand %p1009_p2, %p1003_p13 }
  0x44   :  { %1013 = shalt.err (!%p1010_p3)
}
  0x45   :  { %50 = dma.hbm_to_vmem [thread:$0]  %s1236_s2, 2048, %s45_s15, [#allocation6], %s1067_s7, %s1067_s7, %s1068_s8  }
  0x46   :  { %s1014_s27 = scalar_lea.hbm %s1238_s4, 1024 }
  0x47   :  { %p1015_p4 = scmp.ne.s32.totalorder %s1238_s4, %s1014_s27  ;;  %p1018_p5 = scmp.lt.u32.totalorder %s1014_s27, %s1238_s4 }
  0x49   :  { %p1020_p6 = pnand %p1018_p5, %p1015_p4 }
  0x4b   :  { %1023 = shalt.err (!%p1020_p6)
}
  0x4c   :  { %s1024_s10 = scalar_lea.vmem %s69_s17, 1024  ;;  %p1029_p8 = scmp.lt.s32.totalorder %s69_s17, %s69_s17 }
  0x4d   :  { %p1025_p7 = scmp.ne.s32.totalorder %s69_s17, %s1024_s10  ;;  %p1030_p9 = scmp.lt.s32.totalorder %s1024_s10, %s1024_s10 }
  0x4f   :  { %p1031_p10 = por %p1030_p9, %p1029_p8 }
  0x51   :  { %p1032_p11 = pnand %p1031_p10, %p1025_p7 }
  0x53   :  { %1035 = shalt.err (!%p1032_p11)
}
  0x54   :  { %74 = dma.hbm_to_vmem [thread:$0]  %s1238_s4, 1024, %s69_s17, [#allocation9], %s1067_s7, %s1067_s7, %s1068_s8  }
  0x55   :  { %1058 = dma.done.wait [#allocation3], 256  }
  0x56   :  { %1059 = vsyncadd [#allocation3], 4294967040 }
  0x57   :  { %1060 = dma.done.wait [#allocation6], 2304  }
  0x58   :  { %1061 = vsyncadd [#allocation6], 4294964992 }
  0x59   :  { %1062 = dma.done.wait [#allocation9], 1280  }
  0x5a   :  { %1063 = vsyncadd [#allocation9], 4294966016  ;;  %v1075_v0 = vmov 0.0   ;;  %vm1076_vm0 = vmmov 0   ;;  %v864_v1 = vld [vmem:[#allocation5] sm:$0xff]   ;;  %v865_v2 = vld [vmem:[#allocation5 + $0x8] sm:$0xff]  }
  0x5b   :  { %784 = vmatprep.subr.bf16.mxu0 %v1075_v0  ;;  %788 = vmatprep.mubr.msk.bf16.mxu0 %vm1076_vm0, %v1075_v0  ;;  %v93_v3 = vld [vmem:[#allocation2] sm:$0xff]  ;;  %v94_v4 = vld [vmem:[#allocation2 + $0x8] sm:$0xff]  ;;  %vm117_vm1 = vcmask 261120   ;;  %v868_v17 = vld [vmem:[#allocation7 + $0x10] sm:$0xff]   ;;  %s1077_s12 = smov [#allocation11]  }
  0x5c   :  { %792 = vmatprep.subr.bf16.mxu1 %v1075_v0  ;;  %808 = vmatprep.mubr.msk.bf16.mxu1 %vm1076_vm0, %v1075_v0  ;;  %v95_v5 = vpack.c.bf16 %v94_v4, %v93_v3  ;;  %v702_v6 = vld [vmem:[#allocation8] ss:$0 sm:$0xff]  ;;  %v867_v16 = vld [vmem:[#allocation7 + $0x8] sm:$0xff]   ;;  %v869_v18 = vld [vmem:[#allocation7 + $0x18] sm:$0xff]   ;;  %s688_s13 = sshll.u32 %s1077_s12, 4  ;;  %s689_s13 = int_to_ptr.vmem [resolvable:$true] %s688_s13 }
  0x5d   :  { %785 = vmatpush3.bf16.msra.mxu0 %v864_v1  ;;  %v866_v15 = vld [vmem:[#allocation7] sm:$0xff]   ;;  %v871_v20 = vld [vmem:[#allocation7 + $0x28] sm:$0xff]   ;;  %v872_v21 = vld [vmem:[#allocation7 + $0x30] sm:$0xff]   ;;  %s1036_s15 = scalar_lea.vmem %s689_s13, 128  ;;  %p1041_p13 = scmp.lt.s32.totalorder %s689_s13, %s689_s13 }
  0x5e   :  { %786 = vmatprep.subr.bf16.mxu0 %v1075_v0  ;;  %793 = vmatpush3.bf16.msra.mxu1 %v866_v15  ;;  %v870_v19 = vld [vmem:[#allocation7 + $0x20] sm:$0xff]   ;;  %v873_v22 = vld [vmem:[#allocation7 + $0x38] sm:$0xff]   ;;  %v879_v15 = vld [vmem:[#allocation7 + $0x68] sm:$0xff]   ;;  %p1037_p12 = scmp.ne.s32.totalorder %s689_s13, %s1036_s15  ;;  %p1042_p0 = scmp.lt.s32.totalorder %s1036_s15, %s1036_s15 }
  0x5f   :  { %794 = vmatprep.subr.bf16.mxu1 %v1075_v0  ;;  %v706_v42 = vld [vmem:[#allocation8 + $0x3] ss:$0 sm:$0xff]  ;;  %v707_v45 = vld [vmem:[#allocation8 + $0x6] ss:$0 sm:$0xff]  ;;  %v710_v1 = vld [vmem:[#allocation8 + $0x1] ss:$0 sm:$0xff] }
  0x60   :  { %p1043_p1 = por %p1042_p0, %p1041_p13 }
  0x61   :  { %787 = vmatpush3.bf16.msra.mxu0 %v865_v2 }
  0x62   :  { %812 = vmatprep.subr.bf16.mxu0 %v1075_v0  ;;  %795 = vmatpush3.bf16.msra.mxu1 %v867_v16  ;;  %v880_v16 = vld [vmem:[#allocation7 + $0x70] sm:$0xff]   ;;  %p1044_p2 = pnand %p1043_p1, %p1037_p12 }
  0x63   :  { %796 = vmatprep.subr.bf16.mxu1 %v1075_v0 }
  0x64   :  { %789 = vmatmul.mubr.msk.bf16.vlgmr.msra.gmra.mrb[0].mxu0 %vm117_vm1, %v95_v5 }
  0x65   :  { %828 = vmatprep.mubr.msk.bf16.mxu0 %vm1076_vm0, %v1075_v0 }
  0x66   :  { %797 = vmatpush3.bf16.msra.mxu1 %v868_v17  ;;  %v881_v17 = vld [vmem:[#allocation7 + $0x78] sm:$0xff]  }
  0x67   :  { %798 = vmatprep.subr.bf16.mxu1 %v1075_v0 }
  0x6a   :  { %799 = vmatpush3.bf16.msra.mxu1 %v869_v18 }
  0x6b   :  { %800 = vmatprep.subr.bf16.mxu1 %v1075_v0 }
  0x6e   :  { %801 = vmatpush3.bf16.msra.mxu1 %v870_v19 }
  0x6f   :  { %802 = vmatprep.subr.bf16.mxu1 %v1075_v0 }
  0x72   :  { %803 = vmatpush3.bf16.msra.mxu1 %v871_v20 }
  0x73   :  { %804 = vmatprep.subr.bf16.mxu1 %v1075_v0 }
  0x76   :  { %805 = vmatpush3.bf16.msra.mxu1 %v872_v21 }
  0x77   :  { %806 = vmatprep.subr.bf16.mxu1 %v1075_v0 }
  0x7a   :  { %807 = vmatpush3.bf16.msra.mxu1 %v873_v22 }
  0x7b   :  { %832 = vmatprep.subr.bf16.mxu1 %v1075_v0 }
 0x137   :  { %v155_v7 = vpop.f32.mrb[0].mxu0 }
 0x138   :  { %v156_v8 = vadd.f32 %v702_v6, %v155_v7  ;;  %v790_v9 = vpop.f32.mrb[1].mxu0 }
 0x139   :  { %v158_v10 = vpop.f32.mrb[2].mxu0 }
 0x13a   :  { %v159_v11 = vadd.f32 %v702_v6, %v158_v10  ;;  %164 = vadd.xlane.f32.xlu0 %v156_v8  ;;  %v791_v12 = vpop.f32.mrb[3].mxu0  ;;  %v171_v13 = vmul.f32 %v156_v8, %v156_v8  ;;  %v874_v10 = vld [vmem:[#allocation7 + $0x40] sm:$0xff]  }
 0x13b   :  { %813 = vmatpush3.bf16.msra.mxu0 %v874_v10  ;;  %v876_v12 = vld [vmem:[#allocation7 + $0x50] sm:$0xff]   ;;  %v887_v10 = vld [vmem:[#allocation10 + $0x28] sm:$0xff]  }
 0x13c   :  { %173 = vadd.xlane.f32.xlu1 %v171_v13  ;;  %v172_v14 = vmul.f32 %v159_v11, %v159_v11  ;;  %814 = vmatprep.subr.bf16.mxu0 %v1075_v0  ;;  %v877_v13 = vld [vmem:[#allocation7 + $0x58] sm:$0xff]  }
 0x13e   :  { %166 = vadd.xlane.f32.xlu0 %v159_v11 }
 0x140   :  { %175 = vadd.xlane.f32.xlu1 %v172_v14  ;;  %v878_v14 = vld [vmem:[#allocation7 + $0x60] sm:$0xff]  }
 0x1c7   :  { %v165_v23 = vpop.xlane.xlu0 %164 }
 0x1c8   :  { %v169_v24 = vmul.f32 0.0078125, %v165_v23 }
 0x1c9   :  { %v174_v25 = vpop.xlane.xlu1 %173 }
 0x1ca   :  { %v179_v26 = vmul.f32 %v169_v24, %v169_v24  ;;  %v177_v27 = vmul.f32 0.0078125, %v174_v25 }
 0x1cb   :  { %v167_v28 = vpop.xlane.xlu0 %166 }
 0x1cc   :  { %v181_v29 = vsub.f32 %v177_v27, %v179_v26  ;;  %v170_v30 = vmul.f32 0.0078125, %v167_v28 }
 0x1cd   :  { %v176_v31 = vpop.xlane.xlu1 %175 }
 0x1ce   :  { %v183_v32 = vmax.f32 %v181_v29, 0.0  ;;  %v180_v33 = vmul.f32 %v170_v30, %v170_v30  ;;  %v178_v34 = vmul.f32 0.0078125, %v176_v31 }
 0x1d0   :  { %v185_v35 = vadd.f32 1e-05, %v183_v32  ;;  %v182_v36 = vsub.f32 %v178_v34, %v180_v33 }
 0x1d2   :  { %890 = vrsqrt.f32 %v185_v35  ;;  %v184_v37 = vmax.f32 %v182_v36, 0.0 }
 0x1d4   :  { %v186_v38 = vadd.f32 1e-05, %v184_v37 }
 0x1d6   :  { %892 = vrsqrt.f32 %v186_v38  ;;  %v719_v38 = vld [vmem:[#allocation8 + $0x4] ss:$0 sm:$0xff] }
 0x1dc   :  { %v891_v39 = vpop.eup %890 }
 0x1dd   :  { %v189_v40 = vmul.f32 %v891_v39, %v169_v24  ;;  %v191_v41 = vmul.f32 %v891_v39, %v156_v8 }
 0x1df   :  { %v193_v43 = vsub.f32 %v191_v41, %v189_v40 }
 0x1e0   :  { %v893_v44 = vpop.eup %892 }
 0x1e1   :  { %v190_v46 = vmul.f32 %v893_v44, %v170_v30  ;;  %v192_v47 = vmul.f32 %v893_v44, %v159_v11  ;;  %v199_v48 = vmul.f32 %v706_v42, %v193_v43  ;;  %v875_v11 = vld [vmem:[#allocation7 + $0x48] sm:$0xff]  }
 0x1e2   :  { %815 = vmatpush3.bf16.msra.mxu0 %v875_v11  ;;  %v888_v11 = vld [vmem:[#allocation10 + $0x30] sm:$0xff]  }
 0x1e3   :  { %v194_v49 = vsub.f32 %v192_v47, %v190_v46  ;;  %v205_v50 = vadd.f32 %v707_v45, %v199_v48  ;;  %816 = vmatprep.subr.bf16.mxu0 %v1075_v0 }
 0x1e5   :  { %v200_v51 = vmul.f32 %v706_v42, %v194_v49  ;;  %v708_v52 = vmul.f32 -1.442695, %v205_v50  ;;  %v720_v42 = vld [vmem:[#allocation8 + $0x7] ss:$0 sm:$0xff] }
 0x1e6   :  { %817 = vmatpush3.bf16.msra.mxu0 %v876_v12  ;;  %v889_v12 = vld [vmem:[#allocation10 + $0x38] sm:$0xff]  }
 0x1e7   :  { %v206_v53 = vadd.f32 %v707_v45, %v200_v51  ;;  %894 = vpow2.f32 %v708_v52  ;;  %818 = vmatprep.subr.bf16.mxu0 %v1075_v0 }
 0x1e9   :  { %v709_v54 = vmul.f32 -1.442695, %v206_v53 }
 0x1ea   :  { %819 = vmatpush3.bf16.msra.mxu0 %v877_v13 }
 0x1eb   :  { %896 = vpow2.f32 %v709_v54  ;;  %820 = vmatprep.subr.bf16.mxu0 %v1075_v0 }
 0x1ee   :  { %821 = vmatpush3.bf16.msra.mxu0 %v878_v14 }
 0x1ef   :  { %822 = vmatprep.subr.bf16.mxu0 %v1075_v0 }
 0x1f1   :  { %v895_v55 = vpop.eup %894 }
 0x1f2   :  { %v213_v56 = vadd.f32 1.0, %v895_v55  ;;  %823 = vmatpush3.bf16.msra.mxu0 %v879_v15 }
 0x1f3   :  { %824 = vmatprep.subr.bf16.mxu0 %v1075_v0 }
 0x1f4   :  { %898 = vrcp.f32 %v213_v56 }
 0x1f5   :  { %v897_v57 = vpop.eup %896 }
 0x1f6   :  { %v214_v58 = vadd.f32 1.0, %v897_v57  ;;  %825 = vmatpush3.bf16.msra.mxu0 %v880_v16 }
 0x1f7   :  { %826 = vmatprep.subr.bf16.mxu0 %v1075_v0 }
 0x1f8   :  { %900 = vrcp.f32 %v214_v58 }
 0x1fa   :  { %827 = vmatpush3.bf16.msra.mxu0 %v881_v17 }
 0x1fe   :  { %v899_v59 = vpop.eup %898 }
 0x1ff   :  { %v219_v61 = vmul.f32 %v899_v59, %v205_v50  ;;  %v723_v59 = vld [vmem:[#allocation8 + $0x2] ss:$0 sm:$0xff] }
 0x202   :  { %v901_v60 = vpop.eup %900 }
 0x203   :  { %v220_v62 = vmul.f32 %v901_v60, %v206_v53 }
 0x205   :  { %v221_v63 = vpack.c.bf16 %v220_v62, %v219_v61 }
 0x207   :  { %809 = vmatmul.mubr.bf16.vlgmr.msra.gmra.mrb[0].mxu1 %v221_v63 }
 0x208   :  { %848 = vmatprep.mubr.msk.bf16.mxu1 %vm1076_vm0, %v1075_v0 }
 0x2da   :  { %v325_v2 = vpop.f32.mrb[0].mxu1 }
 0x2db   :  { %v326_v3 = vadd.f32 %v710_v1, %v325_v2  ;;  %v810_v4 = vpop.f32.mrb[1].mxu1 }
 0x2dc   :  { %v328_v5 = vpop.f32.mrb[2].mxu1 }
 0x2dd   :  { %v329_v6 = vadd.f32 %v710_v1, %v328_v5  ;;  %334 = vadd.xlane.f32.xlu0 %v326_v3  ;;  %v811_v7 = vpop.f32.mrb[3].mxu1  ;;  %v340_v8 = vmul.f32 %v326_v3, %v326_v3  ;;  %v882_v5 = vld [vmem:[#allocation10] sm:$0xff]  }
 0x2de   :  { %833 = vmatpush3.bf16.msra.mxu1 %v882_v5  ;;  %v884_v7 = vld [vmem:[#allocation10 + $0x10] sm:$0xff]  }
 0x2df   :  { %336 = vadd.xlane.f32.xlu1 %v329_v6  ;;  %v341_v9 = vmul.f32 %v329_v6, %v329_v6  ;;  %834 = vmatprep.subr.bf16.mxu1 %v1075_v0 }
 0x2e1   :  { %342 = vadd.xlane.f32.xlu0 %v340_v8  ;;  %v885_v8 = vld [vmem:[#allocation10 + $0x18] sm:$0xff]  }
 0x2e3   :  { %344 = vadd.xlane.f32.xlu1 %v341_v9  ;;  %v886_v9 = vld [vmem:[#allocation10 + $0x20] sm:$0xff]  }
 0x36a   :  { %v335_v18 = vpop.xlane.xlu0 %334 }
 0x36b   :  { %v338_v19 = vmul.f32 0.0078125, %v335_v18 }
 0x36c   :  { %v337_v20 = vpop.xlane.xlu1 %336 }
 0x36d   :  { %v339_v21 = vmul.f32 0.0078125, %v337_v20  ;;  %v348_v23 = vmul.f32 %v338_v19, %v338_v19 }
 0x36e   :  { %v343_v22 = vpop.xlane.xlu0 %342 }
 0x36f   :  { %v346_v24 = vmul.f32 0.0078125, %v343_v22  ;;  %v349_v26 = vmul.f32 %v339_v21, %v339_v21 }
 0x370   :  { %v345_v25 = vpop.xlane.xlu1 %344 }
 0x371   :  { %v350_v27 = vsub.f32 %v346_v24, %v348_v23  ;;  %v347_v28 = vmul.f32 0.0078125, %v345_v25 }
 0x373   :  { %v352_v29 = vmax.f32 %v350_v27, 0.0  ;;  %v351_v30 = vsub.f32 %v347_v28, %v349_v26 }
 0x375   :  { %v354_v31 = vadd.f32 1e-05, %v352_v29  ;;  %v353_v32 = vmax.f32 %v351_v30, 0.0 }
 0x377   :  { %902 = vrsqrt.f32 %v354_v31  ;;  %v355_v33 = vadd.f32 1e-05, %v353_v32  ;;  %v732_v32 = vld [vmem:[#allocation8 + $0x5] ss:$0 sm:$0xff] }
 0x379   :  { %904 = vrsqrt.f32 %v355_v33 }
 0x381   :  { %v903_v34 = vpop.eup %902 }
 0x382   :  { %v358_v35 = vmul.f32 %v903_v34, %v338_v19  ;;  %v360_v36 = vmul.f32 %v903_v34, %v326_v3 }
 0x383   :  { %v905_v37 = vpop.eup %904 }
 0x384   :  { %v359_v39 = vmul.f32 %v905_v37, %v339_v21  ;;  %v361_v40 = vmul.f32 %v905_v37, %v329_v6  ;;  %v362_v41 = vsub.f32 %v360_v36, %v358_v35  ;;  %v883_v6 = vld [vmem:[#allocation10 + $0x8] sm:$0xff]   ;;  %v733_v36 = vld [vmem:[#allocation8 + $0x8] ss:$0 sm:$0xff] }
 0x385   :  { %835 = vmatpush3.bf16.msra.mxu1 %v883_v6 }
 0x386   :  { %v363_v43 = vsub.f32 %v361_v40, %v359_v39  ;;  %v368_v44 = vmul.f32 %v719_v38, %v362_v41  ;;  %836 = vmatprep.subr.bf16.mxu1 %v1075_v0 }
 0x388   :  { %v369_v45 = vmul.f32 %v719_v38, %v363_v43  ;;  %v374_v46 = vadd.f32 %v720_v42, %v368_v44 }
 0x389   :  { %837 = vmatpush3.bf16.msra.mxu1 %v884_v7 }
 0x38a   :  { %v375_v47 = vadd.f32 %v720_v42, %v369_v45  ;;  %v721_v48 = vmul.f32 -1.442695, %v374_v46  ;;  %838 = vmatprep.subr.bf16.mxu1 %v1075_v0 }
 0x38c   :  { %906 = vpow2.f32 %v721_v48  ;;  %v722_v49 = vmul.f32 -1.442695, %v375_v47 }
 0x38d   :  { %839 = vmatpush3.bf16.msra.mxu1 %v885_v8 }
 0x38e   :  { %908 = vpow2.f32 %v722_v49  ;;  %840 = vmatprep.subr.bf16.mxu1 %v1075_v0 }
 0x391   :  { %841 = vmatpush3.bf16.msra.mxu1 %v886_v9 }
 0x392   :  { %842 = vmatprep.subr.bf16.mxu1 %v1075_v0 }
 0x395   :  { %843 = vmatpush3.bf16.msra.mxu1 %v887_v10 }
 0x396   :  { %v907_v50 = vpop.eup %906  ;;  %844 = vmatprep.subr.bf16.mxu1 %v1075_v0 }
 0x397   :  { %v382_v51 = vadd.f32 1.0, %v907_v50 }
 0x398   :  { %v909_v52 = vpop.eup %908 }
 0x399   :  { %v383_v53 = vadd.f32 1.0, %v909_v52  ;;  %910 = vrcp.f32 %v382_v51  ;;  %845 = vmatpush3.bf16.msra.mxu1 %v888_v11 }
 0x39a   :  { %846 = vmatprep.subr.bf16.mxu1 %v1075_v0 }
 0x39b   :  { %912 = vrcp.f32 %v383_v53  ;;  %v736_v53 = vld [vmem:[%s1239_s5] ss:$0 sm:$0xff] }
 0x39d   :  { %847 = vmatpush3.bf16.msra.mxu1 %v889_v12 }
 0x3a3   :  { %v911_v54 = vpop.eup %910 }
 0x3a4   :  { %v388_v56 = vmul.f32 %v911_v54, %v374_v46 }
 0x3a5   :  { %v913_v55 = vpop.eup %912 }
 0x3a6   :  { %v389_v57 = vmul.f32 %v913_v55, %v375_v47 }
 0x3a8   :  { %v390_v58 = vpack.c.bf16 %v389_v57, %v388_v56 }
 0x3aa   :  { %829 = vmatmul.mubr.bf16.vlgmr.msra.gmra.mrb[4].mxu0 %v390_v58 }
 0x47d   :  { %v495_v60 = vpop.f32.mrb[4].mxu0 }
 0x47e   :  { %v496_v61 = vadd.f32 %v723_v59, %v495_v60  ;;  %v830_v62 = vpop.f32.mrb[5].mxu0 }
 0x47f   :  { %v498_v63 = vpop.f32.mrb[6].mxu0 }
 0x480   :  { %v499_v1 = vadd.f32 %v723_v59, %v498_v63  ;;  %504 = vadd.xlane.f32.xlu0 %v496_v61  ;;  %v831_v2 = vpop.f32.mrb[7].mxu0  ;;  %v510_v3 = vmul.f32 %v496_v61, %v496_v61 }
 0x482   :  { %506 = vadd.xlane.f32.xlu1 %v499_v1  ;;  %v511_v4 = vmul.f32 %v499_v1, %v499_v1 }
 0x484   :  { %512 = vadd.xlane.f32.xlu0 %v510_v3 }
 0x486   :  { %514 = vadd.xlane.f32.xlu1 %v511_v4 }
 0x50d   :  { %v505_v13 = vpop.xlane.xlu0 %504 }
 0x50e   :  { %v508_v14 = vmul.f32 0.0078125, %v505_v13 }
 0x50f   :  { %v507_v15 = vpop.xlane.xlu1 %506 }
 0x510   :  { %v509_v16 = vmul.f32 0.0078125, %v507_v15  ;;  %v518_v18 = vmul.f32 %v508_v14, %v508_v14 }
 0x511   :  { %v513_v17 = vpop.xlane.xlu0 %512 }
 0x512   :  { %v516_v19 = vmul.f32 0.0078125, %v513_v17  ;;  %v519_v21 = vmul.f32 %v509_v16, %v509_v16 }
 0x513   :  { %v515_v20 = vpop.xlane.xlu1 %514 }
 0x514   :  { %v520_v22 = vsub.f32 %v516_v19, %v518_v18  ;;  %v517_v23 = vmul.f32 0.0078125, %v515_v20 }
 0x516   :  { %v522_v24 = vmax.f32 %v520_v22, 0.0  ;;  %v521_v25 = vsub.f32 %v517_v23, %v519_v21 }
 0x518   :  { %v524_v26 = vadd.f32 1e-05, %v522_v24  ;;  %v523_v27 = vmax.f32 %v521_v25, 0.0 }
 0x51a   :  { %914 = vrsqrt.f32 %v524_v26  ;;  %v525_v28 = vadd.f32 1e-05, %v523_v27 }
 0x51c   :  { %916 = vrsqrt.f32 %v525_v28 }
 0x524   :  { %v915_v0 = vpop.eup %914 }
 0x525   :  { %v528_v29 = vmul.f32 %v915_v0, %v508_v14  ;;  %v530_v30 = vmul.f32 %v915_v0, %v496_v61 }
 0x526   :  { %v917_v31 = vpop.eup %916 }
 0x527   :  { %v529_v33 = vmul.f32 %v917_v31, %v509_v16  ;;  %v531_v34 = vmul.f32 %v917_v31, %v499_v1  ;;  %v532_v35 = vsub.f32 %v530_v30, %v528_v29 }
 0x529   :  { %v533_v37 = vsub.f32 %v531_v34, %v529_v33  ;;  %v538_v38 = vmul.f32 %v732_v32, %v532_v35 }
 0x52b   :  { %v539_v39 = vmul.f32 %v732_v32, %v533_v37  ;;  %v544_v40 = vadd.f32 %v733_v36, %v538_v38 }
 0x52d   :  { %v545_v41 = vadd.f32 %v733_v36, %v539_v39  ;;  %v734_v42 = vmul.f32 -1.442695, %v544_v40 }
 0x52f   :  { %918 = vpow2.f32 %v734_v42  ;;  %v735_v43 = vmul.f32 -1.442695, %v545_v41 }
 0x531   :  { %920 = vpow2.f32 %v735_v43 }
 0x539   :  { %v919_v44 = vpop.eup %918 }
 0x53a   :  { %v552_v45 = vadd.f32 1.0, %v919_v44 }
 0x53b   :  { %v921_v46 = vpop.eup %920 }
 0x53c   :  { %v553_v47 = vadd.f32 1.0, %v921_v46  ;;  %922 = vrcp.f32 %v552_v45 }
 0x53e   :  { %924 = vrcp.f32 %v553_v47 }
 0x546   :  { %v923_v48 = vpop.eup %922 }
 0x547   :  { %v558_v50 = vmul.f32 %v923_v48, %v544_v40 }
 0x548   :  { %v925_v49 = vpop.eup %924 }
 0x549   :  { %v559_v51 = vmul.f32 %v925_v49, %v545_v41 }
 0x54b   :  { %v560_v52 = vpack.c.bf16 %v559_v51, %v558_v50 }
 0x54d   :  { %849 = vmatmul.mubr.bf16.vlgmr.msra.gmra.mrb[4].mxu1 %v560_v52 }
 0x620   :  { %v666_v54 = vpop.f32.mrb[4].mxu1 }
 0x621   :  { %v850_v55 = vpop.f32.mrb[5].mxu1  ;;  %v667_v57 = vadd.f32 %v736_v53, %v666_v54 }
 0x622   :  { %v669_v56 = vpop.f32.mrb[6].mxu1 }
 0x623   :  { %v670_v58 = vadd.f32 %v736_v53, %v669_v56  ;;  %v851_v59 = vpop.f32.mrb[7].mxu1 }
 0x625   :  { %v752_v60 = vpack.c.bf16 %v670_v58, %v667_v57 }
 0x627   :  { %753 = vst [vmem:[#allocation11] sm:$0xff] %v752_v60  }
 0x628   :  { %1047 = shalt.err (!%p1044_p2)
}
 0x629   :  { %s1048_s17 = scalar_lea.hbm %s1240_s6, 128 }
 0x62a   :  { %p1049_p3 = scmp.ne.s32.totalorder %s1240_s6, %s1048_s17  ;;  %p1052_p4 = scmp.lt.u32.totalorder %s1048_s17, %s1240_s6 }
 0x62c   :  { %p1054_p5 = pnand %p1052_p4, %p1049_p3 }
 0x62e   :  { %1057 = shalt.err (!%p1054_p5)
}
 0x62f   :  { %694 = dma.vmem_to_hbm [thread:$0]  %s689_s13, 128, %s1240_s6, [#allocation4], %s1067_s7, %s1067_s7, %s1068_s8  }
 0x630   :  { %1064 = dma.done.wait [#allocation4], 128  }
 0x631   :  { %1065 = vsyncadd [#allocation4], 4294967168 }
 0x632   :  { %698 = vsyncpa [#allocation3], 1 }
 0x633   :  { %699 = vsyncpa [#allocation6], 1 }
 0x634   :  { %700 = vsyncpa [#allocation9], 1 }
 0x635   :  { %701 = vsyncpa [#allocation4], 1 }

</bundles_post_ra>
